<compile_context>
chip_gen: v7x
topology: tpu7x:2x2x1
jax: 0.10.0
libtpu: 0.0.40
codegen_flags: <defaults>
</compile_context>

<pallas_src>
import functools

import jax
import jax.numpy as jnp
from jax import lax
from jax.experimental import pallas as pl
from jax.experimental.pallas import tpu as pltpu


def _round_up(v, m):
    return (v + m - 1) // m * m


def fire1d_kernel(x_ref, ws_ref, bs_ref, w1_ref, b1_ref, w3_ref, b3_ref, o_ref,
                  *, l_real):
    # x_ref : (1, Cin_p, L_p)        ws_ref: (s_p, Cin_p)   bs_ref: (s_p, 1)
    # w1_ref: (e1p, s_p)             b1_ref: (e1p, 1)
    # w3_ref: (e3p, 3*s_p) fused     b3_ref: (e3p, 1)
    # o_ref : (1, e1p + e3p, L_p)    channels [0:e1p)=expand1, [e1p:)=expand3
    x = x_ref[0]                                             # (Cin_p, L_p)
    L_p = x.shape[-1]
    e1p = w1_ref.shape[0]

    # ---- squeeze (1x1 conv) + ReLU:  (s_p, Cin_p) @ (Cin_p, L_p) ----------
    y = jnp.dot(ws_ref[...], x, preferred_element_type=jnp.float32)
    y = jnp.maximum(y + bs_ref[...], 0.0)                    # (s_p, L_p)

    # ---- shifted copies along L (lane axis) via XLU roll + boundary mask --
    # y_prev[:, t] = y[:, t-1] (zero at t==0); y_next[:, t] = y[:, t+1]
    # (zero at t==l_real-1, matching Conv1d padding=1 zero padding).
    col = lax.broadcasted_iota(jnp.int32, (1, L_p), 1)
    y_prev = jnp.where(col >= 1, pltpu.roll(y, 1, axis=1), 0.0)
    y_next = jnp.where(col < l_real - 1, pltpu.roll(y, L_p - 1, axis=1), 0.0)

    # ---- expand1 (1x1 conv):  (e1p, s_p) @ (s_p, L_p) ---------------------
    z1 = jnp.dot(w1_ref[...], y, preferred_element_type=jnp.float32)
    z1 = z1 + b1_ref[...]

    # ---- expand3 (k=3, pad=1) fused into one K=3*s matmul -----------------
    y3 = jnp.concatenate([y_prev, y, y_next], axis=0)        # (3*s_p, L_p)
    z3 = jnp.dot(w3_ref[...], y3, preferred_element_type=jnp.float32)
    z3 = z3 + b3_ref[...]

    # ---- ReLU epilogue, stored straight into disjoint channel ranges ------
    o_ref[0, 0:e1p, :] = jnp.maximum(z1, 0.0).astype(o_ref.dtype)
    o_ref[0, e1p:, :] = jnp.maximum(z3, 0.0).astype(o_ref.dtype)


def fire1d_pallas(x_ncl, ws, bs, w1, b1, w3, b3):
    """x_ncl: (N, Cin, L). Returns (N, e1+e3, L) matching PyTorch Fire1d."""
    N, Cin, L = x_ncl.shape
    s = ws.shape[0]
    e1 = w1.shape[0]
    e3 = w3.shape[0]

    # Pad channels to sublane multiples (8 for f32) and L to a lane multiple
    # (128) so blocks obey the (8,128) rule and stores are unmasked.
    Cin_p = _round_up(Cin, 8)
    s_p = _round_up(s, 8)
    e1p = _round_up(e1, 8)
    e3p = _round_up(e3, 8)
    L_p = _round_up(L, 128)
    Cout_p = e1p + e3p

    x_p = jnp.pad(x_ncl, ((0, 0), (0, Cin_p - Cin), (0, L_p - L)))
    ws_p = jnp.pad(ws, ((0, s_p - s), (0, Cin_p - Cin)))
    bs_p = jnp.pad(bs, (0, s_p - s)).reshape(s_p, 1)
    w1_p = jnp.pad(w1, ((0, e1p - e1), (0, s_p - s)))
    b1_p = jnp.pad(b1, (0, e1p - e1)).reshape(e1p, 1)
    # w3: PyTorch (e3, s, 3)  ->  fused (e3p, 3*s_p) with K blocks k=0,1,2
    # multiplying y_prev, y, y_next respectively.
    w3_kes = jnp.transpose(w3, (2, 0, 1))                            # (3, e3, s)
    w3_kes = jnp.pad(w3_kes, ((0, 0), (0, e3p - e3), (0, s_p - s)))  # (3, e3p, s_p)
    w3_f = jnp.transpose(w3_kes, (1, 0, 2)).reshape(e3p, 3 * s_p)
    b3_p = jnp.pad(b3, (0, e3p - e3)).reshape(e3p, 1)

    kernel = functools.partial(fire1d_kernel, l_real=L)

    out_p = pl.pallas_call(
        kernel,
        out_shape=jax.ShapeDtypeStruct((N, Cout_p, L_p), x_ncl.dtype),
        grid_spec=pltpu.PrefetchScalarGridSpec(
            num_scalar_prefetch=0,
            grid=(N,),
            in_specs=[
                pl.BlockSpec((1, Cin_p, L_p), lambda n: (n, 0, 0)),
                # Weights / biases: constant index_map -> stay VMEM-resident.
                pl.BlockSpec((s_p, Cin_p), lambda n: (0, 0)),
                pl.BlockSpec((s_p, 1), lambda n: (0, 0)),
                pl.BlockSpec((e1p, s_p), lambda n: (0, 0)),
                pl.BlockSpec((e1p, 1), lambda n: (0, 0)),
                pl.BlockSpec((e3p, 3 * s_p), lambda n: (0, 0)),
                pl.BlockSpec((e3p, 1), lambda n: (0, 0)),
            ],
            out_specs=pl.BlockSpec((1, Cout_p, L_p), lambda n: (n, 0, 0)),
        ),
        compiler_params=pltpu.CompilerParams(
            dimension_semantics=("parallel",)),
    )(x_p, ws_p, bs_p, w1_p, b1_p, w3_f, b3_p)

    # Strip padding: expand1 channels live in [0:e1), expand3 in [e1p:e1p+e3).
    if e1 == e1p:
        out = out_p[:, : e1 + e3, :L]
    else:
        out = jnp.concatenate(
            [out_p[:, :e1, :L], out_p[:, e1p:e1p + e3, :L]], axis=1)
    return out


def fire1d_reference(x_ncl, ws, bs, w1, b1, w3, b3):
    """Pure-JAX reference using lax convs (NCL layout, PyTorch semantics)."""
    dn = ("NCH", "OIH", "NCH")
    y = lax.conv_general_dilated(x_ncl, ws[:, :, None], (1,), [(0, 0)],
                                 dimension_numbers=dn) + bs[None, :, None]
    y = jnp.maximum(y, 0.0)
    z1 = lax.conv_general_dilated(y, w1[:, :, None], (1,), [(0, 0)],
                                  dimension_numbers=dn) + b1[None, :, None]
    z3 = lax.conv_general_dilated(y, w3, (1,), [(1, 1)],
                                  dimension_numbers=dn) + b3[None, :, None]
    return jnp.maximum(jnp.concatenate([z1, z3], axis=1), 0.0)


if __name__ == "__main__":
    # Fire1d(in_channel=8, s=8, e1=8, e3=8), input (N=2, C=8, L=16)
    N, Cin, L = 2, 8, 16
    s, e1, e3 = 8, 8, 8

    key = jax.random.PRNGKey(0)
    k = jax.random.split(key, 8)
    x = jax.random.normal(k[0], (N, Cin, L), dtype=jnp.float32)
    ws = jax.random.normal(k[1], (s, Cin), dtype=jnp.float32) * 0.3
    bs = jax.random.normal(k[2], (s,), dtype=jnp.float32) * 0.1
    w1 = jax.random.normal(k[3], (e1, s), dtype=jnp.float32) * 0.3
    b1 = jax.random.normal(k[4], (e1,), dtype=jnp.float32) * 0.1
    w3 = jax.random.normal(k[5], (e3, s, 3), dtype=jnp.float32) * 0.3
    b3 = jax.random.normal(k[6], (e3,), dtype=jnp.float32) * 0.1

    out = fire1d_pallas(x, ws, bs, w1, b1, w3, b3)
    out = jax.block_until_ready(out)

    ref = fire1d_reference(x, ws, bs, w1, b1, w3, b3)
    assert out.shape == (N, e1 + e3, L), out.shape
    assert jnp.allclose(out, ref, atol=1e-5, rtol=1e-5), \
        float(jnp.max(jnp.abs(out - ref)))

    print("KERNEL_OK")
</pallas_src>

<mosaic_0001>
module attributes {stable_mosaic.version = 11 : i64} {
  func.func @fire1d_kernel(%arg0: i32, %arg1: memref<1x8x128xf32, #tpu.memory_space<vmem>>, %arg2: memref<8x8xf32, #tpu.memory_space<vmem>>, %arg3: memref<8x1xf32, #tpu.memory_space<vmem>>, %arg4: memref<8x8xf32, #tpu.memory_space<vmem>>, %arg5: memref<8x1xf32, #tpu.memory_space<vmem>>, %arg6: memref<8x24xf32, #tpu.memory_space<vmem>>, %arg7: memref<8x1xf32, #tpu.memory_space<vmem>>, %arg8: memref<1x16x128xf32, #tpu.memory_space<vmem>>) attributes {dimension_semantics = [#tpu.dimension_semantics<parallel>], iteration_bounds = array<i64: 2>, scalar_prefetch = 0 : i64, scratch_operands = 0 : i64, tpu.core_type = #tpu.core_type<tc>, window_params = [{transform_indices = @transform_0, window_bounds = array<i64: 1, 8, 128>}, {pipeline_mode = #tpu.pipeline_mode<synchronous>, transform_indices = @transform_1, window_bounds = array<i64: 8, 8>}, {pipeline_mode = #tpu.pipeline_mode<synchronous>, transform_indices = @transform_2, window_bounds = array<i64: 8, 1>}, {pipeline_mode = #tpu.pipeline_mode<synchronous>, transform_indices = @transform_3, window_bounds = array<i64: 8, 8>}, {pipeline_mode = #tpu.pipeline_mode<synchronous>, transform_indices = @transform_4, window_bounds = array<i64: 8, 1>}, {pipeline_mode = #tpu.pipeline_mode<synchronous>, transform_indices = @transform_5, window_bounds = array<i64: 8, 24>}, {pipeline_mode = #tpu.pipeline_mode<synchronous>, transform_indices = @transform_6, window_bounds = array<i64: 8, 1>}, {transform_indices = @transform_7, window_bounds = array<i64: 1, 16, 128>}]} {
    %c0 = arith.constant 0 : index
    %c0_0 = arith.constant 0 : index
    %c0_1 = arith.constant 0 : index
    %0 = vector.load %arg1[%c0, %c0_0, %c0_1] : memref<1x8x128xf32, #tpu.memory_space<vmem>>, vector<1x8x128xf32>
    %1 = vector.shape_cast %0 : vector<1x8x128xf32> to vector<8x128xf32>
    %c0_2 = arith.constant 0 : index
    %c0_3 = arith.constant 0 : index
    %2 = vector.load %arg2[%c0_2, %c0_3] : memref<8x8xf32, #tpu.memory_space<vmem>>, vector<8x8xf32>
    %cst = arith.constant dense<0.000000e+00> : vector<8x128xf32>
    %3 = tpu.matmul %2, %1, %cst {dimension_numbers = #tpu.dot_dimension_numbers<[1], [0], [0], [1], [0, 0, 1, 1], [], []>} : vector<8x8xf32>, vector<8x128xf32>, vector<8x128xf32> -> vector<8x128xf32>
    %c0_4 = arith.constant 0 : index
    %c0_5 = arith.constant 0 : index
    %4 = vector.load %arg3[%c0_4, %c0_5] : memref<8x1xf32, #tpu.memory_space<vmem>>, vector<8x1xf32>
    %5 = vector.broadcast %4 : vector<8x1xf32> to vector<8x128xf32>
    %6 = arith.addf %3, %5 : vector<8x128xf32>
    %cst_6 = arith.constant 0.000000e+00 : f32
    %7 = vector.broadcast %cst_6 : f32 to vector<8x128xf32>
    %8 = arith.maximumf %6, %7 : vector<8x128xf32>
    %9 = tpu.iota {dimensions = array<i32: 1>} : vector<1x128xi32>
    %c1_i32 = arith.constant 1 : i32
    %10 = vector.broadcast %c1_i32 : i32 to vector<1x128xi32>
    %11 = arith.cmpi sge, %9, %10 : vector<1x128xi32>
    %c1_i32_7 = arith.constant 1 : i32
    %12 = tpu.dynamic_rotate %8 by %c1_i32_7 dim 1 : vector<8x128xf32>, i32 -> vector<8x128xf32>
    %cst_8 = arith.constant 0.000000e+00 : f32
    %13 = vector.shape_cast %11 : vector<1x128xi1> to vector<1x128xi1>
    %14 = vector.broadcast %13 : vector<1x128xi1> to vector<8x128xi1>
    %15 = vector.broadcast %cst_8 : f32 to vector<8x128xf32>
    %16 = arith.select %14, %12, %15 : vector<8x128xi1>, vector<8x128xf32>
    %c15_i32 = arith.constant 15 : i32
    %17 = vector.broadcast %c15_i32 : i32 to vector<1x128xi32>
    %18 = arith.cmpi slt, %9, %17 : vector<1x128xi32>
    %c127_i32 = arith.constant 127 : i32
    %19 = tpu.dynamic_rotate %8 by %c127_i32 dim 1 : vector<8x128xf32>, i32 -> vector<8x128xf32>
    %cst_9 = arith.constant 0.000000e+00 : f32
    %20 = vector.shape_cast %18 : vector<1x128xi1> to vector<1x128xi1>
    %21 = vector.broadcast %20 : vector<1x128xi1> to vector<8x128xi1>
    %22 = vector.broadcast %cst_9 : f32 to vector<8x128xf32>
    %23 = arith.select %21, %19, %22 : vector<8x128xi1>, vector<8x128xf32>
    %c0_10 = arith.constant 0 : index
    %c0_11 = arith.constant 0 : index
    %24 = vector.load %arg4[%c0_10, %c0_11] : memref<8x8xf32, #tpu.memory_space<vmem>>, vector<8x8xf32>
    %cst_12 = arith.constant dense<0.000000e+00> : vector<8x128xf32>
    %25 = tpu.matmul %24, %8, %cst_12 {dimension_numbers = #tpu.dot_dimension_numbers<[1], [0], [0], [1], [0, 0, 1, 1], [], []>} : vector<8x8xf32>, vector<8x128xf32>, vector<8x128xf32> -> vector<8x128xf32>
    %c0_13 = arith.constant 0 : index
    %c0_14 = arith.constant 0 : index
    %26 = vector.load %arg5[%c0_13, %c0_14] : memref<8x1xf32, #tpu.memory_space<vmem>>, vector<8x1xf32>
    %27 = vector.broadcast %26 : vector<8x1xf32> to vector<8x128xf32>
    %28 = arith.addf %25, %27 : vector<8x128xf32>
    %29 = tpu.concatenate %16, %8, %23 in 0 : vector<8x128xf32>, vector<8x128xf32>, vector<8x128xf32> -> vector<24x128xf32>
    %c0_15 = arith.constant 0 : index
    %c0_16 = arith.constant 0 : index
    %30 = vector.load %arg6[%c0_15, %c0_16] : memref<8x24xf32, #tpu.memory_space<vmem>>, vector<8x24xf32>
    %cst_17 = arith.constant dense<0.000000e+00> : vector<8x128xf32>
    %31 = tpu.matmul %30, %29, %cst_17 {dimension_numbers = #tpu.dot_dimension_numbers<[1], [0], [0], [1], [0, 0, 1, 1], [], []>} : vector<8x24xf32>, vector<24x128xf32>, vector<8x128xf32> -> vector<8x128xf32>
    %c0_18 = arith.constant 0 : index
    %c0_19 = arith.constant 0 : index
    %32 = vector.load %arg7[%c0_18, %c0_19] : memref<8x1xf32, #tpu.memory_space<vmem>>, vector<8x1xf32>
    %33 = vector.broadcast %32 : vector<8x1xf32> to vector<8x128xf32>
    %34 = arith.addf %31, %33 : vector<8x128xf32>
    %cst_20 = arith.constant 0.000000e+00 : f32
    %35 = vector.broadcast %cst_20 : f32 to vector<8x128xf32>
    %36 = arith.maximumf %28, %35 : vector<8x128xf32>
    %c0_21 = arith.constant 0 : index
    %c0_22 = arith.constant 0 : index
    %c0_23 = arith.constant 0 : index
    %37 = vector.load %arg8[%c0_21, %c0_22, %c0_23] : memref<1x16x128xf32, #tpu.memory_space<vmem>>, vector<1x8x128xf32>
    %38 = vector.shape_cast %37 : vector<1x8x128xf32> to vector<8x128xf32>
    %39 = vector.shape_cast %36 : vector<8x128xf32> to vector<1x8x128xf32>
    tpu.vector_store %arg8[%c0_21, %c0_22, %c0_23], %39 {strides = array<i32>} : memref<1x16x128xf32, #tpu.memory_space<vmem>>, vector<1x8x128xf32>,
    %cst_24 = arith.constant 0.000000e+00 : f32
    %40 = vector.broadcast %cst_24 : f32 to vector<8x128xf32>
    %41 = arith.maximumf %34, %40 : vector<8x128xf32>
    %c0_25 = arith.constant 0 : index
    %c8 = arith.constant 8 : index
    %c0_26 = arith.constant 0 : index
    %42 = vector.load %arg8[%c0_25, %c8, %c0_26] : memref<1x16x128xf32, #tpu.memory_space<vmem>>, vector<1x8x128xf32>
    %43 = vector.shape_cast %42 : vector<1x8x128xf32> to vector<8x128xf32>
    %44 = vector.shape_cast %41 : vector<8x128xf32> to vector<1x8x128xf32>
    tpu.vector_store %arg8[%c0_25, %c8, %c0_26], %44 {strides = array<i32>} : memref<1x16x128xf32, #tpu.memory_space<vmem>>, vector<1x8x128xf32>,
    return
  }
  func.func @transform_0(%arg0: i32) -> (i32, i32, i32) {
    %c0_i32 = arith.constant 0 : i32
    %c0_i32_0 = arith.constant 0 : i32
    %c0_i32_1 = arith.constant 0 : i32
    return %arg0, %c0_i32, %c0_i32_0 : i32, i32, i32
  }
  func.func @transform_1(%arg0: i32) -> (i32, i32) {
    %c0_i32 = arith.constant 0 : i32
    %c0_i32_0 = arith.constant 0 : i32
    %c0_i32_1 = arith.constant 0 : i32
    return %c0_i32, %c0_i32_0 : i32, i32
  }
  func.func @transform_2(%arg0: i32) -> (i32, i32) {
    %c0_i32 = arith.constant 0 : i32
    %c0_i32_0 = arith.constant 0 : i32
    %c0_i32_1 = arith.constant 0 : i32
    return %c0_i32, %c0_i32_0 : i32, i32
  }
  func.func @transform_3(%arg0: i32) -> (i32, i32) {
    %c0_i32 = arith.constant 0 : i32
    %c0_i32_0 = arith.constant 0 : i32
    %c0_i32_1 = arith.constant 0 : i32
    return %c0_i32, %c0_i32_0 : i32, i32
  }
  func.func @transform_4(%arg0: i32) -> (i32, i32) {
    %c0_i32 = arith.constant 0 : i32
    %c0_i32_0 = arith.constant 0 : i32
    %c0_i32_1 = arith.constant 0 : i32
    return %c0_i32, %c0_i32_0 : i32, i32
  }
  func.func @transform_5(%arg0: i32) -> (i32, i32) {
    %c0_i32 = arith.constant 0 : i32
    %c0_i32_0 = arith.constant 0 : i32
    %c0_i32_1 = arith.constant 0 : i32
    return %c0_i32, %c0_i32_0 : i32, i32
  }
  func.func @transform_6(%arg0: i32) -> (i32, i32) {
    %c0_i32 = arith.constant 0 : i32
    %c0_i32_0 = arith.constant 0 : i32
    %c0_i32_1 = arith.constant 0 : i32
    return %c0_i32, %c0_i32_0 : i32, i32
  }
  func.func @transform_7(%arg0: i32) -> (i32, i32, i32) {
    %c0_i32 = arith.constant 0 : i32
    %c0_i32_0 = arith.constant 0 : i32
    %c0_i32_1 = arith.constant 0 : i32
    return %arg0, %c0_i32, %c0_i32_0 : i32, i32, i32
  }
}

</mosaic_0001>

<bundles_post_ra>
// kernel: tpu_custom_call.1
= control target key start
LH: loop header
LB: loop body
LE: loop exit
PB: predicated region body
PF: predicated region fallthrough
CT: control target
= control target key end

     0   :  { %12 = vsyncpa [#allocation3], 0  ;;  %s950_s0 = inlined_call_operand.vmem [shape: f32[2,8,128], index: 0, kind: input, shape index: {}]   ;;  %s951_s1 = inlined_call_operand.vmem [shape: f32[8,8], index: 1, kind: input, shape index: {}]   ;;  %s952_s2 = inlined_call_operand.vmem [shape: f32[8,1], index: 2, kind: input, shape index: {}]   ;;  %s953_s3 = inlined_call_operand.vmem [shape: f32[8,8], index: 3, kind: input, shape index: {}]   ;;  %s954_s4 = inlined_call_operand.vmem [shape: f32[8,1], index: 4, kind: input, shape index: {}]   ;;  %s955_s5 = inlined_call_operand.vmem [shape: f32[8,24], index: 5, kind: input, shape index: {}]   ;;  %s956_s6 = inlined_call_operand.vmem [shape: f32[8,1], index: 6, kind: input, shape index: {}]   ;;  %s957_s7 = inlined_call_operand.hbm [shape: f32[2,16,128], index: 7, kind: output, shape index: {}]  }
   0x1   :  { %14 = vsyncpa [#allocation3 + $0x1], 0  ;;  %s824_s24 = smov 0   ;;  %s826_s25 = smov 0  }
   0x2   :  { %s828_s26 = smov 0   ;;  %s830_s27 = smov 0  }
   0x3 LB: > { %s845_s28 = sadd.s32 4294967295, %s772_s27   ;;  %s612_s29 = sadd.s32 4294967294, %s772_s27   ;;  %s772_s27 = sphi %s830_s27, %s963_s27   ;;  %s768_s26 = sphi %s828_s26, %s962_s26   ;;  %s764_s25 = sphi %s826_s25, %s961_s25   ;;  %s760_s24 = sphi %s824_s24, %s960_s24  }
   0x4   : > { %s849_s30 = sadd.s32 1, %s772_s27   ;;  %s179_s8 = sadd.s32 1, %s768_s26 }
   0x5   : > { %s176_s9 = ssub.s32 %s772_s27, %s849_s30  ;;  %p189_p0 = scmp.ne.s32.totalorder %s768_s26, %s764_s25 }
   0x6   : > { %p177_p1 = scmp.eq.s32.totalorder %s176_s9, 0  ;;  %p190_p2 = scmp.eq.s32.totalorder %s845_s28, 1 }
   0x7   : > { %p195_p3 = scmp.ne.s32.totalorder %s764_s25, %s760_s24  ;;  %p196_p4 = scmp.eq.s32.totalorder %s612_s29, 1 }
   0x8   : > { %s860_s10 = scalar_select %p177_p1, %s768_s26, %s179_s8  }
   0x9   : > { %p862_p5 = por %p190_p2, %p189_p0  ;;  %p866_p6 = por %p196_p4, %p195_p3 }
   0xa   : > { %p615_p7 = scmp.ge.s32.totalorder %s772_s27, 1  ;;  %p239_p8 = scmp.lt.s32.totalorder %s772_s27, 3 }
   0xc   : > { %p240_p9 = pnand %p615_p7, %p239_p8 }
   0xd   : > { %p270_p10 = scmp.lt.s32.totalorder (!%p240_p9), %s845_s28, 1  ;;  %v774_v0 = vmov (!%p240_p9), 0.0   ;;  %vm775_vm0 = vmmov (!%p240_p9), 0   ;;  %v276_v1 = vld [vmem:[%s952_s2] sm:$0xff] (!%p240_p9)  ;;  %v776_v2 = vmov (!%p240_p9), 0   ;;  %vm282_vm1 = vcmask (!%p240_p9), 64512  }
   0xe   : > { %243 = sbr.rel (%p240_p9) target bundleno = 596 (0x254), region = 48  ;;  %637 = vmatprep.subr.mxu1 (!%p240_p9), %v774_v0  ;;  %639 = vmatprep.mubr.msk.f32.mxu1 (!%p240_p9), %vm775_vm0, %v774_v0  ;;  %v275_v3 = vld [vmem:[%s951_s1] sm:$0xff] (!%p240_p9)  ;;  %v777_v5 = vmov (!%p240_p9), 0.0|0.0   ;;  %s778_s29 = smov (!%p240_p9), 127   ;;  %v357_v14 = vlaneseq (!%p240_p9)  ;;  %vm780_vm3 = vmmov (!%p240_p9), 1   ;;  %vm458_vm6 = vcmask (!%p240_p9), 195584  }
   0xf   : > { %708 = vset.pattern.permute.xlu0 (!%p240_p9), %v776_v2  ;;  %653 = vmatprep.mubr.msk.f32.mxu0 (!%p240_p9), %vm775_vm0, %v774_v0  ;;  %v371_v11 = vld [vmem:[%s953_s3] sm:$0xff] (!%p240_p9)  ;;  %s779_s8 = smov (!%p240_p9), 1   ;;  %s267_s18 = sand.u32 (!%p240_p9), 1, %s764_s25  }
  0x10   : > { %279 = vperm.xlu0 (!%p240_p9), %708, %v276_v1   ;;  %709 = vset.pattern.permute.xlu1 (!%p240_p9), %v776_v2  ;;  %v452_v12 = vld [vmem:[%s956_s6] sm:$0xff] (!%p240_p9)  ;;  %v358_v15 = vand.u32 (!%p240_p9), 127, %v357_v14  ;;  %s628_s22 = sshll.u32 (!%p240_p9), %s845_s28, 8  ;;  %s909_s9 = scalar_lea.sflag (!%p240_p9), [#allocation3], %s267_s18 }
  0x11   : > { %656 = vmatprep.subr.bf16.mxu0 (!%p240_p9), %v777_v5  ;;  %v372_v13 = vld [vmem:[%s954_s4] sm:$0xff] (!%p240_p9) }
  0x12   : > { %vm359_vm2 = vcmp.ge.s32.totalorder (!%p240_p9), %v358_v15, 1  ;;  %vm365_vm5 = vcmp.lt.s32.totalorder (!%p240_p9), %v358_v15, 15  ;;  %v451_v18 = vld [vmem:[%s955_s5] sm:$0xff] (!%p240_p9) }
  0x13   : > { %vm658_vm4 = vmpackc.low (!%p240_p9), %vm780_vm3, %vm359_vm2 }
  0x15   : > { %s271_s15 = scalar_select %p270_p10, %s845_s28, 1 }
  0x16   : > { %s781_s28 = smov [#allocation2]  }
  0x17   : > { %s617_s16 = sshll.u32 %s271_s15, 3  ;;  %s714_s14 = sshll.u32 %s781_s28, 4  ;;  %s715_s14 = int_to_ptr.vmem [resolvable:$false] %s714_s14 }
  0x18   : > { %s273_s19 = scalar_lea.vmem %s950_s0, %s617_s16  ;;  %s716_s15 = scalar_lea.vmem %s715_s14, 512 }
  0x19   : > { %v274_v4 = vld [vmem:[%s273_s19] sm:$0xff]  ;;  %s616_s19 = sshll.u32 %s267_s18, 4 }
  0x1a   : > { %638 = vmatpush3.msra.mxu1 %v274_v4  ;;  %s269_s20 = scalar_lea.vmem [#allocation2], %s616_s19 }
  0x1b   : > { %640 = vmatmul.mubr.msk.f32.vlgmr.msra.gmra.mrb[0].mxu1 %vm282_vm1, %v275_v3  ;;  %642 = vmatprep.subr.mxu1 %v774_v0  ;;  %s550_s21 = sshll.u32 %s269_s20, 4  ;;  %s902_s21 = int_to_ptr.vmem [resolvable:$true] %s550_s21 }
  0x1c   : > { %644 = vmatprep.mubr.msk.f32.mxu1 %vm775_vm0, %v774_v0  ;;  %s710_s13 = scalar_lea.vmem %s902_s21, 256  ;;  %p717_p0 = scmp.lt.s32.totalorder %s902_s21, %s715_s14 }
  0x1d   : > { %p711_p11 = scmp.ne.s32.totalorder %s902_s21, %s710_s13  ;;  %p718_p1 = scmp.lt.s32.totalorder %s716_s15, %s710_s13 }
  0x1f   : > { %p712_p12 = pnand %p711_p11, %p862_p5  ;;  %p719_p2 = por %p718_p1, %p717_p0 }
  0x21   : > { %p713_p13 = pneg %p712_p12 }
  0x23   : > { %p720_p3 = pnand %p719_p2, %p713_p13 }
  0x8f   : > { %v280_v6 = vpop.permute.xlu0 %279 }
  0xee   : > { %v352_v7 = vpop.f32.mrb[0].mxu1 }
  0xef   : > { %v353_v8 = vadd.f32 %v352_v7, %v280_v6  ;;  %v641_v9 = vpop.f32.mrb[1].mxu1 }
  0xf1   : > { %v356_v10 = vmax.f32 %v353_v8, 0.0 }
  0xf3   : > { %366 = vrot.lane.b32.xlu1 %v356_v10, %s778_s29  ;;  %360 = vrot.lane.b32.xlu0 %v356_v10, %s779_s8  ;;  %s907_s8 = scalar_lea.hbm %s957_s7, %s628_s22 }
  0xf4   : > { %643 = vmatpush3.msra.mxu1 %v356_v10 }
  0xf5   : > { %645 = vmatmul.mubr.msk.f32.vlgmr.msra.gmra.mrb[2].mxu1 %vm282_vm1, %v371_v11 }
  0xf7   : > { %455 = vperm.xlu0 %708, %v452_v12   ;;  %375 = vperm.xlu1 %709, %v372_v13  }
 0x165   : > { %v361_v16 = vpop.permute.xlu0 %360  ;;  %v367_v19 = vpop.permute.xlu1 %366 }
 0x166   : > { %v657_v17 = vpack.c.bf16 %v356_v10, %v361_v16 }
 0x168   : > { %659 = vmatpush3.bf16.msk.msra.mxu0 %vm658_vm4, %v657_v17 }
 0x169   : > { %651 = vmatprep.subr.mxu0 %v774_v0 }
 0x16c   : > { %652 = vmatpush3.msk.msra.mxu0 %vm365_vm5, %v367_v19 }
 0x16d   : > { %654 = vmatmul.mubr.msk.f32.vlgmr.msra.gmra.mrb[0].mxu0 %vm458_vm6, %v451_v18 }
 0x176   : > { %v376_v20 = vpop.permute.xlu1 %375  ;;  %v456_v25 = vpop.permute.xlu0 %455 }
 0x1c8   : > { %v447_v21 = vpop.f32.mrb[2].mxu1 }
 0x1c9   : > { %v448_v22 = vadd.f32 %v447_v21, %v376_v20  ;;  %v646_v23 = vpop.f32.mrb[3].mxu1 }
 0x1cb   : > { %v532_v24 = vmax.f32 %v448_v22, 0.0 }
 0x1cd   : > { %533 = vst [vmem:[%s269_s20] sm:$0xff] %v532_v24 }
 0x240   : > { %v528_v26 = vpop.f32.mrb[0].mxu0 }
 0x241   : > { %v529_v27 = vadd.f32 %v528_v26, %v456_v25  ;;  %v655_v28 = vpop.f32.mrb[1].mxu0 }
 0x243   : > { %v534_v29 = vmax.f32 %v529_v27, 0.0 }
 0x245   : > { %535 = vst [vmem:[%s269_s20 + $0x8] sm:$0xff] %v534_v29 }
 0x246   : > { %723 = shalt.err (!%p720_p3)
}
 0x247   : > { %s724_s16 = scalar_lea.hbm %s907_s8, 256  ;;  %s728_s19 = scalar_lea.hbm %s957_s7, 512 }
 0x248   : > { %p725_p4 = scmp.ne.s32.totalorder %s907_s8, %s724_s16  ;;  %p729_p9 = scmp.lt.u32.totalorder %s907_s8, %s957_s7 }
 0x249   : > { %p730_p10 = scmp.lt.u32.totalorder %s728_s19, %s724_s16  ;;  %p732_p12 = scmp.lt.u32.totalorder %s724_s16, %s907_s8 }
 0x24a   : > { %p726_p7 = pnand %p725_p4, %p862_p5 }
 0x24b   : > { %p731_p11 = por %p730_p10, %p729_p9 }
 0x24c   : > { %p727_p8 = pneg %p726_p7 }
 0x24d   : > { %p733_p13 = por %p732_p12, %p731_p11 }
 0x24f   : > { %p734_p0 = pnand %p733_p13, %p727_p8 }
 0x251   : > { %737 = shalt.err (!%p734_p0)
}
 0x252   : > { %s782_s23 = smov 128   ;;  %s783_s29 = smov 8  }
 0x253   : > { %660 = dma.vmem_to_hbm [thread:$0]  (%p862_p5), %s902_s21, 256, %s907_s8, %s909_s9, %s782_s23, %s782_s23, %s783_s29  }
 0x254 PF: > { %p666_p1 = scmp.ge.s32.totalorder %s772_s27, 2  ;;  %s565_s13 = sand.u32 1, %s760_s24  }
 0x255   : > { %s566_s28 = scalar_lea.sflag [#allocation3], %s565_s13 }
 0x256   : > { %p663_p2 = pnand %p666_p1, %p866_p6 }
 0x258   : > { %755 = dma.done.wait (!%p663_p2), %s566_s28, 256  }
 0x259   : > { %757 = vsyncadd (!%p663_p2), %s566_s28, 4294967040  ;;  %p17_p3 = scmp.ge.s32.totalorder %s849_s30, 4   ;;  %s960_s24 = smov %s764_s25 }
 0x25a   : > { %s961_s25 = smov %s768_s26  ;;  %s962_s26 = smov %s860_s10 }
 0x25b   : > { %s963_s27 = smov %s849_s30  ;;  %19 = sbr.rel (!%p17_p3) target bundleno = 3 (0x3), region = 83 }
 0x262   :  { %571 = vsyncpa [#allocation3], 1 }
 0x263   :  { %573 = vsyncpa [#allocation3 + $0x1], 1 }

</bundles_post_ra>
